<compile_context>
chip_gen: v5e
topology: v5e:2x2
jax: 0.10.0
libtpu: 0.0.40
codegen_flags: <defaults>
</compile_context>

<pallas_src>
import functools

import jax
import jax.numpy as jnp
from jax.experimental import pallas as pl
from jax.experimental.pallas import tpu as pltpu


def _latent_space_kernel(x_ref, w1_ref, gb_ref, wp_ref, bp_ref, eps_ref,
                         out_ref, *, weight, latent_dim):
    L = latent_dim
    x = x_ref[...]                                           # (B, D_in) f32

    # ---- Linear(input_dim -> 128), bias-free ---------------------------
    # b1 is mathematically cancelled by the training-mode BN mean subtraction.
    h = jnp.dot(x, w1_ref[...], preferred_element_type=jnp.float32)   # (B, H)

    # ---- BatchNorm1d(128), training mode, folded into a single FMA -----
    mean = jnp.mean(h, axis=0, keepdims=True)                # (1, H)
    c = h - mean
    var = jnp.mean(c * c, axis=0, keepdims=True)             # biased variance
    gb = gb_ref[...]                                         # (2, H)
    gamma = gb[0:1, :]
    beta = gb[1:2, :]
    scale = gamma * jax.lax.rsqrt(var + 1e-5)                # (1, H)
    shift = beta - mean * scale                              # (1, H)
    h = h * scale + shift                                    # one (B,H) FMA

    # ---- SiLU (sigmoid on the EUP slot) ---------------------------------
    h = h * jax.nn.sigmoid(h)

    # ---- fused fc_mu / fc_logvar: one (H, 2L) GEMM ----------------------
    proj = jnp.dot(h, wp_ref[...], preferred_element_type=jnp.float32) \
        + bp_ref[...]                                        # (B, 2L) = [mu | lv]
    mu = proj[:, :L]
    lv = proj[:, L:]

    # ---- reparametrization trick + tanh ---------------------------------
    sigma = jnp.exp(0.5 * lv)                                # sqrt(exp(logvar))
    z = jnp.tanh(mu + weight * sigma * eps_ref[...])

    # ---- single lane-packed output slab: [mu | logvar | z], one store ----
    out_ref[...] = jnp.concatenate([proj, z], axis=1)


def latent_space_forward(x, params, eps, *, weight=1.0):
    """x: (B, D_in) f32; eps: (B, latent_dim) f32 standard-normal noise."""
    B, D_in = x.shape
    H = params["w1"].shape[1]          # 128
    L = params["wmu"].shape[1]         # latent_dim

    # Pack the small parameter tensors (in real usage these would be packed
    # once at init time rather than per call).
    gb = jnp.concatenate([params["gamma"], params["beta"]], axis=0)    # (2, H)
    wp = jnp.concatenate([params["wmu"], params["wlv"]], axis=1)       # (H, 2L)
    bp = jnp.concatenate([params["bmu"], params["blv"]], axis=1)       # (1, 2L)

    full = lambda shape: pl.BlockSpec(shape, lambda i: (0,) * len(shape))
    kernel = functools.partial(
        _latent_space_kernel, weight=float(weight), latent_dim=L)

    flops = (2 * B * D_in * H            # first GEMM
             + 2 * B * H * (2 * L)       # fused projection GEMM
             + 10 * B * H + 8 * B * L)   # BN / SiLU / reparam elementwise
    transcendentals = B * H + 2 * B * L  # sigmoid, exp, tanh
    bytes_accessed = 4 * (B * D_in + D_in * H + 2 * H + H * 2 * L + 2 * L
                          + B * L + B * 3 * L)

    out = pl.pallas_call(
        kernel,
        grid=(1,),
        in_specs=[
            full((B, D_in)),            # x
            full((D_in, H)),            # w1
            full((2, H)),               # [gamma; beta]
            full((H, 2 * L)),           # [wmu | wlv]
            full((1, 2 * L)),           # [bmu | blv]
            full((B, L)),               # eps
        ],
        out_specs=full((B, 3 * L)),
        out_shape=jax.ShapeDtypeStruct((B, 3 * L), jnp.float32),
        compiler_params=pltpu.CompilerParams(
            dimension_semantics=("arbitrary",)),
        cost_estimate=pl.CostEstimate(
            flops=flops,
            transcendentals=transcendentals,
            bytes_accessed=bytes_accessed),
    )(x, params["w1"], gb, wp, bp, eps)

    return {"mu": out[:, :L], "logvar": out[:, L:2 * L], "z": out[:, 2 * L:]}


def init_params(key, input_dim, latent_dim, hidden=128):
    """Deterministic PyTorch-style uniform(-1/sqrt(fan_in), 1/sqrt(fan_in)) init."""
    ks = jax.random.split(key, 6)

    def lin(kw, kb, fan_in, fan_out):
        bound = 1.0 / jnp.sqrt(fan_in)
        w = jax.random.uniform(kw, (fan_in, fan_out), jnp.float32, -bound, bound)
        b = jax.random.uniform(kb, (1, fan_out), jnp.float32, -bound, bound)
        return w, b

    w1, b1 = lin(ks[0], ks[1], input_dim, hidden)
    wmu, bmu = lin(ks[2], ks[3], hidden, latent_dim)
    wlv, blv = lin(ks[4], ks[5], hidden, latent_dim)
    return {
        "w1": w1, "b1": b1,                            # b1 kept for the reference;
        "gamma": jnp.ones((1, hidden), jnp.float32),   # the kernel drops it (BN cancels it)
        "beta": jnp.zeros((1, hidden), jnp.float32),
        "wmu": wmu, "bmu": bmu,
        "wlv": wlv, "blv": blv,
    }


if __name__ == "__main__":
    B, INPUT_DIM, LATENT_DIM = 8, 256, 16   # small shapes consistent with the module

    key = jax.random.PRNGKey(0)
    k_param, k_x, k_eps = jax.random.split(key, 3)

    params = init_params(k_param, INPUT_DIM, LATENT_DIM)
    x = jax.random.normal(k_x, (B, INPUT_DIM), jnp.float32)
    # The PyTorch module samples eps ~ Normal(0,1) inside forward; here the
    # (deterministic) noise is drawn with a PRNGKey and passed into the kernel.
    # TODO(synk): could instead use pltpu.prng_seed + pltpu.stateful_normal
    # in-kernel, at the cost of a different random stream than the reference.
    eps = jax.random.normal(k_eps, (B, LATENT_DIM), jnp.float32)

    out = latent_space_forward(x, params, eps, weight=1.0)
    jax.block_until_ready(out)

    # lightweight sanity check against a pure-JAX reference (full module math,
    # including b1 — the kernel drops it because BN mean-subtraction cancels it)
    h = x @ params["w1"] + params["b1"]
    m = h.mean(0, keepdims=True)
    v = ((h - m) ** 2).mean(0, keepdims=True)
    h = (h - m) / jnp.sqrt(v + 1e-5) * params["gamma"] + params["beta"]
    h = h * jax.nn.sigmoid(h)
    mu_ref = h @ params["wmu"] + params["bmu"]
    lv_ref = h @ params["wlv"] + params["blv"]
    z_ref = jnp.tanh(mu_ref + jnp.exp(0.5 * lv_ref) * eps)
    assert jnp.allclose(out["mu"], mu_ref, atol=1e-4)
    assert jnp.allclose(out["logvar"], lv_ref, atol=1e-4)
    assert jnp.allclose(out["z"], z_ref, atol=1e-4)

    print("KERNEL_OK")
</pallas_src>

<mosaic_0001>
module attributes {stable_mosaic.version = 11 : i64} {
  func.func @_latent_space_kernel(%arg0: i32, %arg1: memref<8x256xf32, #tpu.memory_space<vmem>>, %arg2: memref<256x128xf32, #tpu.memory_space<vmem>>, %arg3: memref<2x128xf32, #tpu.memory_space<vmem>>, %arg4: memref<128x32xf32, #tpu.memory_space<vmem>>, %arg5: memref<1x32xf32, #tpu.memory_space<vmem>>, %arg6: memref<8x16xf32, #tpu.memory_space<vmem>>, %arg7: memref<8x48xf32, #tpu.memory_space<vmem>>) attributes {dimension_semantics = [#tpu.dimension_semantics<arbitrary>], iteration_bounds = array<i64: 1>, scalar_prefetch = 0 : i64, scratch_operands = 0 : i64, tpu.core_type = #tpu.core_type<tc>, window_params = [{pipeline_mode = #tpu.pipeline_mode<synchronous>, transform_indices = @transform_0, window_bounds = array<i64: 8, 256>}, {pipeline_mode = #tpu.pipeline_mode<synchronous>, transform_indices = @transform_1, window_bounds = array<i64: 256, 128>}, {pipeline_mode = #tpu.pipeline_mode<synchronous>, transform_indices = @transform_2, window_bounds = array<i64: 2, 128>}, {pipeline_mode = #tpu.pipeline_mode<synchronous>, transform_indices = @transform_3, window_bounds = array<i64: 128, 32>}, {pipeline_mode = #tpu.pipeline_mode<synchronous>, transform_indices = @transform_4, window_bounds = array<i64: 1, 32>}, {pipeline_mode = #tpu.pipeline_mode<synchronous>, transform_indices = @transform_5, window_bounds = array<i64: 8, 16>}, {pipeline_mode = #tpu.pipeline_mode<synchronous>, transform_indices = @transform_6, window_bounds = array<i64: 8, 48>}]} {
    %c0 = arith.constant 0 : index
    %c0_0 = arith.constant 0 : index
    %0 = vector.load %arg1[%c0, %c0_0] : memref<8x256xf32, #tpu.memory_space<vmem>>, vector<8x256xf32>
    %c0_1 = arith.constant 0 : index
    %c0_2 = arith.constant 0 : index
    %1 = vector.load %arg2[%c0_1, %c0_2] : memref<256x128xf32, #tpu.memory_space<vmem>>, vector<256x128xf32>
    %cst = arith.constant dense<0.000000e+00> : vector<8x128xf32>
    %2 = tpu.matmul %0, %1, %cst {dimension_numbers = #tpu.dot_dimension_numbers<[1], [0], [0], [1], [0, 0, 1, 1], [], []>} : vector<8x256xf32>, vector<256x128xf32>, vector<8x128xf32> -> vector<8x128xf32>
    %cst_3 = arith.constant dense<0.000000e+00> : vector<128xf32>
    %3 = vector.multi_reduction <add>, %2, %cst_3 [0] : vector<8x128xf32> to vector<128xf32>
    %4 = vector.shape_cast %3 : vector<128xf32> to vector<1x128xf32>
    %cst_4 = arith.constant 8.000000e+00 : f32
    %5 = vector.broadcast %cst_4 : f32 to vector<1x128xf32>
    %6 = arith.divf %4, %5 : vector<1x128xf32>
    %7 = vector.broadcast %6 : vector<1x128xf32> to vector<8x128xf32>
    %8 = arith.subf %2, %7 : vector<8x128xf32>
    %9 = arith.mulf %8, %8 : vector<8x128xf32>
    %cst_5 = arith.constant dense<0.000000e+00> : vector<128xf32>
    %10 = vector.multi_reduction <add>, %9, %cst_5 [0] : vector<8x128xf32> to vector<128xf32>
    %11 = vector.shape_cast %10 : vector<128xf32> to vector<1x128xf32>
    %cst_6 = arith.constant 8.000000e+00 : f32
    %12 = vector.broadcast %cst_6 : f32 to vector<1x128xf32>
    %13 = arith.divf %11, %12 : vector<1x128xf32>
    %c0_7 = arith.constant 0 : index
    %c0_8 = arith.constant 0 : index
    %14 = vector.load %arg3[%c0_7, %c0_8] : memref<2x128xf32, #tpu.memory_space<vmem>>, vector<2x128xf32>
    %15 = vector.extract_strided_slice %14 {offsets = [0, 0], sizes = [1, 128], strides = [1, 1]} : vector<2x128xf32> to vector<1x128xf32>
    %16 = vector.extract_strided_slice %14 {offsets = [1, 0], sizes = [1, 128], strides = [1, 1]} : vector<2x128xf32> to vector<1x128xf32>
    %cst_9 = arith.constant 9.99999974E-6 : f32
    %17 = vector.broadcast %cst_9 : f32 to vector<1x128xf32>
    %18 = arith.addf %13, %17 : vector<1x128xf32>
    %19 = math.rsqrt %18 : vector<1x128xf32>
    %20 = arith.mulf %15, %19 : vector<1x128xf32>
    %21 = arith.mulf %6, %20 : vector<1x128xf32>
    %22 = arith.subf %16, %21 : vector<1x128xf32>
    %23 = vector.broadcast %20 : vector<1x128xf32> to vector<8x128xf32>
    %24 = arith.mulf %2, %23 : vector<8x128xf32>
    %25 = vector.broadcast %22 : vector<1x128xf32> to vector<8x128xf32>
    %26 = arith.addf %24, %25 : vector<8x128xf32>
    %27 = arith.negf %26 : vector<8x128xf32>
    %28 = math.exp %27 : vector<8x128xf32>
    %cst_10 = arith.constant 1.000000e+00 : f32
    %29 = vector.broadcast %cst_10 : f32 to vector<8x128xf32>
    %30 = arith.addf %29, %28 : vector<8x128xf32>
    %31 = arith.divf %29, %30 : vector<8x128xf32>
    %32 = arith.mulf %26, %31 : vector<8x128xf32>
    %c0_11 = arith.constant 0 : index
    %c0_12 = arith.constant 0 : index
    %33 = vector.load %arg4[%c0_11, %c0_12] : memref<128x32xf32, #tpu.memory_space<vmem>>, vector<128x32xf32>
    %cst_13 = arith.constant dense<0.000000e+00> : vector<8x32xf32>
    %34 = tpu.matmul %32, %33, %cst_13 {dimension_numbers = #tpu.dot_dimension_numbers<[1], [0], [0], [1], [0, 0, 1, 1], [], []>} : vector<8x128xf32>, vector<128x32xf32>, vector<8x32xf32> -> vector<8x32xf32>
    %c0_14 = arith.constant 0 : index
    %c0_15 = arith.constant 0 : index
    %35 = vector.load %arg5[%c0_14, %c0_15] : memref<1x32xf32, #tpu.memory_space<vmem>>, vector<1x32xf32>
    %36 = vector.broadcast %35 : vector<1x32xf32> to vector<8x32xf32>
    %37 = arith.addf %34, %36 : vector<8x32xf32>
    %38 = vector.extract_strided_slice %37 {offsets = [0, 0], sizes = [8, 16], strides = [1, 1]} : vector<8x32xf32> to vector<8x16xf32>
    %39 = vector.extract_strided_slice %37 {offsets = [0, 16], sizes = [8, 16], strides = [1, 1]} : vector<8x32xf32> to vector<8x16xf32>
    %cst_16 = arith.constant 5.000000e-01 : f32
    %40 = vector.broadcast %cst_16 : f32 to vector<8x16xf32>
    %41 = arith.mulf %40, %39 : vector<8x16xf32>
    %42 = math.exp %41 : vector<8x16xf32>
    %cst_17 = arith.constant 1.000000e+00 : f32
    %43 = vector.broadcast %cst_17 : f32 to vector<8x16xf32>
    %44 = arith.mulf %43, %42 : vector<8x16xf32>
    %c0_18 = arith.constant 0 : index
    %c0_19 = arith.constant 0 : index
    %45 = vector.load %arg6[%c0_18, %c0_19] : memref<8x16xf32, #tpu.memory_space<vmem>>, vector<8x16xf32>
    %46 = arith.mulf %44, %45 : vector<8x16xf32>
    %47 = arith.addf %38, %46 : vector<8x16xf32>
    %48 = math.tanh %47 : vector<8x16xf32>
    %49 = tpu.concatenate %37, %48 in 1 : vector<8x32xf32>, vector<8x16xf32> -> vector<8x48xf32>
    %c0_20 = arith.constant 0 : index
    %c0_21 = arith.constant 0 : index
    %50 = vector.load %arg7[%c0_20, %c0_21] : memref<8x48xf32, #tpu.memory_space<vmem>>, vector<8x48xf32>
    tpu.vector_store %arg7[%c0_20, %c0_21], %49 {strides = array<i32>} : memref<8x48xf32, #tpu.memory_space<vmem>>, vector<8x48xf32>,
    return
  }
  func.func @transform_0(%arg0: i32) -> (i32, i32) {
    %c0_i32 = arith.constant 0 : i32
    %c0_i32_0 = arith.constant 0 : i32
    %c0_i32_1 = arith.constant 0 : i32
    return %c0_i32, %c0_i32_0 : i32, i32
  }
  func.func @transform_1(%arg0: i32) -> (i32, i32) {
    %c0_i32 = arith.constant 0 : i32
    %c0_i32_0 = arith.constant 0 : i32
    %c0_i32_1 = arith.constant 0 : i32
    return %c0_i32, %c0_i32_0 : i32, i32
  }
  func.func @transform_2(%arg0: i32) -> (i32, i32) {
    %c0_i32 = arith.constant 0 : i32
    %c0_i32_0 = arith.constant 0 : i32
    %c0_i32_1 = arith.constant 0 : i32
    return %c0_i32, %c0_i32_0 : i32, i32
  }
  func.func @transform_3(%arg0: i32) -> (i32, i32) {
    %c0_i32 = arith.constant 0 : i32
    %c0_i32_0 = arith.constant 0 : i32
    %c0_i32_1 = arith.constant 0 : i32
    return %c0_i32, %c0_i32_0 : i32, i32
  }
  func.func @transform_4(%arg0: i32) -> (i32, i32) {
    %c0_i32 = arith.constant 0 : i32
    %c0_i32_0 = arith.constant 0 : i32
    %c0_i32_1 = arith.constant 0 : i32
    return %c0_i32, %c0_i32_0 : i32, i32
  }
  func.func @transform_5(%arg0: i32) -> (i32, i32) {
    %c0_i32 = arith.constant 0 : i32
    %c0_i32_0 = arith.constant 0 : i32
    %c0_i32_1 = arith.constant 0 : i32
    return %c0_i32, %c0_i32_0 : i32, i32
  }
  func.func @transform_6(%arg0: i32) -> (i32, i32) {
    %c0_i32 = arith.constant 0 : i32
    %c0_i32_0 = arith.constant 0 : i32
    %c0_i32_1 = arith.constant 0 : i32
    return %c0_i32, %c0_i32_0 : i32, i32
  }
}

</mosaic_0001>

<bundles_post_ra>
// kernel: tpu_custom_call.1
= control target key start
LH: loop header
LB: loop body
LE: loop exit
PB: predicated region body
PF: predicated region fallthrough
CT: control target
= control target key end

     0   :  { %11 = vsyncpa [#allocation3], 0  ;;  %s451_s0 = inlined_call_operand.vmem [shape: f32[8,256], index: 0, kind: input, shape index: {}]   ;;  %s452_s1 = inlined_call_operand.hbm [shape: f32[256,128], index: 1, kind: input, shape index: {}]   ;;  %s453_s2 = inlined_call_operand.vmem [shape: f32[2,128], index: 2, kind: input, shape index: {}]   ;;  %s454_s3 = inlined_call_operand.vmem [shape: f32[128,32], index: 3, kind: input, shape index: {}]   ;;  %s455_s4 = inlined_call_operand.vmem [shape: f32[1,32], index: 4, kind: input, shape index: {}]   ;;  %s456_s5 = inlined_call_operand.vmem [shape: f32[8,16], index: 5, kind: input, shape index: {}]   ;;  %s457_s6 = inlined_call_operand.hbm [shape: f32[8,48], index: 6, kind: output, shape index: {}]  }
   0x1   :  { %12 = vsyncpa [#allocation4], 0  ;;  %s19_s23 = sshll.u32 %s452_s1, 4  ;;  %s333_s24 = smov [#allocation2]   ;;  %s20_s23 = int_to_ptr.hbm [resolvable:$true] %s19_s23 }
   0x2   :  { %s21_s25 = sshll.u32 %s333_s24, 4  ;;  %s334_s26 = smov 128   ;;  %s22_s25 = int_to_ptr.vmem [resolvable:$true] %s21_s25 }
   0x3   :  { %s335_s27 = smov 8  }
   0x4   :  { %27 = dma.hbm_to_vmem [thread:$0]  %s20_s23, 4096, %s22_s25, [#allocation3], %s334_s26, %s334_s26, %s335_s27  }
   0x5   :  { %329 = dma.done.wait [#allocation3], 4096  }
   0x6   :  { %330 = vsyncadd [#allocation3], 4294963200  ;;  %v57_v0 = vld [vmem:[#allocation2 + $0x78] sm:$0xff]  ;;  %v56_v2 = vld [vmem:[#allocation2 + $0x70] sm:$0xff]  ;;  %v336_v34 = vmov 8.0   ;;  %s337_s15 = smov 16  }
   0x7   :  { %v73_v1 = vld [vmem:[#allocation2 + $0xf8] sm:$0xff]  ;;  %74 = vmatpush.msra.mxu0 %v57_v0  ;;  %v72_v3 = vld [vmem:[#allocation2 + $0xf0] sm:$0xff]  ;;  %v55_v4 = vld [vmem:[#allocation2 + $0x68] sm:$0xff]  ;;  %269 = vrcp.f32 %v336_v34  ;;  %s338_s16 = smov 112   ;;  %s339_s17 = smov 32   ;;  %vm238_vm8 = vcmask 261120  }
   0x8   :  { %94 = vmatpush.msra.mxu1 %v73_v1  ;;  %v71_v5 = vld [vmem:[#allocation2 + $0xe8] sm:$0xff]  ;;  %v54_v6 = vld [vmem:[#allocation2 + $0x60] sm:$0xff]  ;;  %v53_v8 = vld [vmem:[#allocation2 + $0x58] sm:$0xff]  ;;  %s340_s18 = smov [#allocation5]   ;;  %s249_s21 = sshll.u32 %s457_s6, 4  ;;  %vm240_vm9 = vcmask 392192   ;;  %s250_s21 = int_to_ptr.hbm [resolvable:$true] %s249_s21 }
   0x9   :  { %75 = vmatpush.msra.mxu0 %v56_v2  ;;  %v70_v7 = vld [vmem:[#allocation2 + $0xe0] sm:$0xff]  ;;  %v69_v9 = vld [vmem:[#allocation2 + $0xd8] sm:$0xff]  ;;  %v52_v10 = vld [vmem:[#allocation2 + $0x50] sm:$0xff]  ;;  %s247_s19 = sshll.u32 %s340_s18, 4  ;;  %s248_s19 = int_to_ptr.vmem [resolvable:$true] %s247_s19 }
   0xa   :  { %95 = vmatpush.msra.mxu1 %v72_v3  ;;  %v68_v11 = vld [vmem:[#allocation2 + $0xd0] sm:$0xff]  ;;  %v51_v12 = vld [vmem:[#allocation2 + $0x48] sm:$0xff]  ;;  %v50_v14 = vld [vmem:[#allocation2 + $0x40] sm:$0xff] }
   0xb   :  { %76 = vmatpush.msra.mxu0 %v55_v4  ;;  %v67_v13 = vld [vmem:[#allocation2 + $0xc8] sm:$0xff]  ;;  %v66_v15 = vld [vmem:[#allocation2 + $0xc0] sm:$0xff]  ;;  %v49_v16 = vld [vmem:[#allocation2 + $0x38] sm:$0xff] }
   0xc   :  { %96 = vmatpush.msra.mxu1 %v71_v5  ;;  %v65_v17 = vld [vmem:[#allocation2 + $0xb8] sm:$0xff]  ;;  %v48_v18 = vld [vmem:[#allocation2 + $0x30] sm:$0xff]  ;;  %v47_v20 = vld [vmem:[#allocation2 + $0x28] sm:$0xff] }
   0xd   :  { %77 = vmatpush.msra.mxu0 %v54_v6  ;;  %v64_v19 = vld [vmem:[#allocation2 + $0xb0] sm:$0xff]  ;;  %v63_v21 = vld [vmem:[#allocation2 + $0xa8] sm:$0xff]  ;;  %v46_v22 = vld [vmem:[#allocation2 + $0x20] sm:$0xff]  ;;  %v270_v35 = vpop.eup %269 }
   0xe   :  { %97 = vmatpush.msra.mxu1 %v70_v7  ;;  %v62_v23 = vld [vmem:[#allocation2 + $0xa0] sm:$0xff]  ;;  %v45_v24 = vld [vmem:[#allocation2 + $0x18] sm:$0xff]  ;;  %v44_v26 = vld [vmem:[#allocation2 + $0x10] sm:$0xff]  ;;  %v121_v36 = vmul.f32 8.0, %v270_v35  ;;  %vm125_vm0 = vweird.f32 %v270_v35 }
   0xf   :  { %78 = vmatpush.msra.mxu0 %v53_v8  ;;  %v61_v25 = vld [vmem:[#allocation2 + $0x98] sm:$0xff]  ;;  %v60_v27 = vld [vmem:[#allocation2 + $0x90] sm:$0xff]  ;;  %v43_v28 = vld [vmem:[#allocation2 + $0x8] sm:$0xff] }
  0x10   :  { %98 = vmatpush.msra.mxu1 %v69_v9  ;;  %v59_v29 = vld [vmem:[#allocation2 + $0x88] sm:$0xff]  ;;  %v42_v30 = vld [vmem:[#allocation2] sm:$0xff]  ;;  %v122_v39 = vsub.f32 1.0, %v121_v36  ;;  %v194_v49 = vld [vmem:[%s454_s3 + $0x78] sm:$0xff] }
  0x11   :  { %79 = vmatpush.msra.mxu0 %v52_v10  ;;  %v58_v31 = vld [vmem:[#allocation2 + $0x80] sm:$0xff]  ;;  %v41_v33 = vld [vmem:[%s451_s0 + $0x8] sm:$0xff]  ;;  %v193_v50 = vld [vmem:[%s454_s3 + $0x70] sm:$0xff]  ;;  %199 = vmatpush.msra.mxu2 %v194_v49 }
  0x12   :  { %99 = vmatpush.msra.mxu1 %v68_v11  ;;  %v40_v32 = vld [vmem:[%s451_s0] sm:$0xff]  ;;  %v123_v42 = vmul.f32 %v270_v35, %v122_v39  ;;  %v192_v52 = vld [vmem:[%s454_s3 + $0x68] sm:$0xff]  ;;  %v190_v56 = vld [vmem:[%s454_s3 + $0x58] sm:$0xff] }
  0x13   :  { %80 = vmatpush.msra.mxu0 %v51_v12  ;;  %200 = vmatpush.msra.mxu2 %v193_v50  ;;  %v191_v54 = vld [vmem:[%s454_s3 + $0x60] sm:$0xff]  ;;  %v189_v58 = vld [vmem:[%s454_s3 + $0x50] sm:$0xff]  ;;  %v188_v60 = vld [vmem:[%s454_s3 + $0x48] sm:$0xff] }
  0x14   :  { %100 = vmatpush.msra.mxu1 %v67_v13  ;;  %v124_v45 = vadd.f32 %v270_v35, %v123_v42  ;;  %v187_v62 = vld [vmem:[%s454_s3 + $0x40] sm:$0xff]  ;;  %v186_v0 = vld [vmem:[%s454_s3 + $0x38] sm:$0xff]  ;;  %v185_v2 = vld [vmem:[%s454_s3 + $0x30] sm:$0xff] }
  0x15   :  { %81 = vmatpush.msra.mxu0 %v50_v14  ;;  %201 = vmatpush.msra.mxu2 %v192_v52  ;;  %v184_v4 = vld [vmem:[%s454_s3 + $0x28] sm:$0xff]  ;;  %v183_v6 = vld [vmem:[%s454_s3 + $0x20] sm:$0xff]  ;;  %v182_v8 = vld [vmem:[%s454_s3 + $0x18] sm:$0xff] }
  0x16   :  { %101 = vmatpush.msra.mxu1 %v66_v15  ;;  %v126_v48 = vsel %vm125_vm0, %v270_v35, %v124_v45  ;;  %v181_v10 = vld [vmem:[%s454_s3 + $0x10] sm:$0xff]  ;;  %v180_v11 = vld [vmem:[%s454_s3 + $0x8] sm:$0xff]  ;;  %v179_v12 = vld [vmem:[%s454_s3] sm:$0xff] }
  0x17   :  { %82 = vmatpush.msra.mxu0 %v49_v16  ;;  %202 = vmatpush.msra.mxu2 %v191_v54 }
  0x18   :  { %102 = vmatpush.msra.mxu1 %v65_v17 }
  0x19   :  { %83 = vmatpush.msra.mxu0 %v48_v18  ;;  %203 = vmatpush.msra.mxu2 %v190_v56  ;;  %v137_v18 = vld [vmem:[%s453_s2] sm:$0x3] }
  0x1a   :  { %103 = vmatpush.msra.mxu1 %v64_v19 }
  0x1b   :  { %84 = vmatpush.msra.mxu0 %v47_v20  ;;  %204 = vmatpush.msra.mxu2 %v189_v58 }
  0x1c   :  { %104 = vmatpush.msra.mxu1 %v63_v21 }
  0x1d   :  { %85 = vmatpush.msra.mxu0 %v46_v22  ;;  %205 = vmatpush.msra.mxu2 %v188_v60 }
  0x1e   :  { %105 = vmatpush.msra.mxu1 %v62_v23 }
  0x1f   :  { %86 = vmatpush.msra.mxu0 %v45_v24  ;;  %206 = vmatpush.msra.mxu2 %v187_v62 }
  0x20   :  { %106 = vmatpush.msra.mxu1 %v61_v25 }
  0x21   :  { %87 = vmatpush.msra.mxu0 %v44_v26  ;;  %207 = vmatpush.msra.mxu2 %v186_v0 }
  0x22   :  { %107 = vmatpush.msra.mxu1 %v60_v27 }
  0x23   :  { %88 = vmatpush.msra.mxu0 %v43_v28  ;;  %208 = vmatpush.msra.mxu2 %v185_v2 }
  0x24   :  { %108 = vmatpush.msra.mxu1 %v59_v29  ;;  %v222_v29 = vld [vmem:[%s456_s5] sm:$0xff] }
  0x25   :  { %89 = vmatpush.msra.mxu0 %v42_v30  ;;  %209 = vmatpush.msra.mxu2 %v184_v4 }
  0x26   :  { %109 = vmatpush.msra.mxu1 %v58_v31  ;;  %90 = vmatmul.f32.vlgmr.msra.gmra.mxu0 %v40_v32 }
  0x27   :  { %110 = vmatmul.f32.vlgmr.msra.gmra.mxu1 %v41_v33  ;;  %210 = vmatpush.msra.mxu2 %v183_v6 }
  0x28   :  { %224 = vrot.lane.b32.xlu0 %v222_v29, %s337_s15 }
  0x29   :  { %211 = vmatpush.msra.mxu2 %v182_v8 }
  0x2b   :  { %212 = vmatpush.msra.mxu2 %v181_v10 }
  0x2d   :  { %213 = vmatpush.msra.mxu2 %v180_v11 }
  0x2f   :  { %214 = vmatpush.msra.mxu2 %v179_v12 }
  0x9a   :  { %v225_v49 = vpop.permute.xlu0 %224 }
  0xa3   :  { %v91_v37 = vpop.f32.mrf.mxu0 }
  0xa4   :  { %v111_v38 = vpop.f32.mrf.mxu1 }
  0xa5   :  { %v385_v40 = vadd.f32 %v111_v38, %v91_v37 }
  0xa7   :  { %v114_v41 = vrot.slane %v385_v40, 4 }
  0xa9   :  { %v115_v43 = vadd.f32 %v114_v41, %v385_v40 }
  0xab   :  { %v116_v44 = vrot.slane %v115_v43, 2 }
  0xad   :  { %v117_v46 = vadd.f32 %v116_v44, %v115_v43  ;;  %v268_v44 = vld [vmem:[%s455_s4] ss:$0 sm:$0xff] }
  0xaf   :  { %v118_v47 = vrot.slane %v117_v46, 1 }
  0xb1   :  { %v119_v51 = vadd.f32 %v118_v47, %v117_v46 }
  0xb3   :  { %v127_v53 = vmul.f32 %v126_v48, %v119_v51 }
  0xb5   :  { %v128_v55 = vsub.f32 %v385_v40, %v127_v53 }
  0xb7   :  { %v129_v57 = vmul.f32 %v128_v55, %v128_v55 }
  0xb9   :  { %v130_v59 = vrot.slane %v129_v57, 4 }
  0xbb   :  { %v131_v61 = vadd.f32 %v130_v59, %v129_v57 }
  0xbd   :  { %v132_v63 = vrot.slane %v131_v61, 2 }
  0xbf   :  { %v133_v1 = vadd.f32 %v132_v63, %v131_v61 }
  0xc1   :  { %v134_v3 = vrot.slane %v133_v1, 1 }
  0xc3   :  { %v135_v5 = vadd.f32 %v134_v3, %v133_v1 }
  0xc5   :  { %v136_v7 = vmul.f32 %v135_v5, %v126_v48 }
  0xc7   :  { %v138_v9 = vadd.f32 1e-05, %v136_v7 }
  0xc9   :  { %271 = vrsqrt.f32 %v138_v9  ;;  %vm145_vm2 = vweird.f32 %v138_v9 }
  0xcf   :  { %v272_v13 = vpop.eup %271 }
  0xd0   :  { %v140_v14 = vmul.f32 %v272_v13, %v138_v9  ;;  %vm146_vm1 = vweird.f32 %v272_v13 }
  0xd1   :  { %vm147_vm3 = vmor %vm145_vm2, %vm146_vm1 }
  0xd2   :  { %v141_v15 = vmul.f32 %v272_v13, %v140_v14 }
  0xd4   :  { %v142_v16 = vmul.f32 0.5, %v141_v15 }
  0xd6   :  { %v143_v17 = vsub.f32 1.5, %v142_v16 }
  0xd8   :  { %v144_v19 = vmul.f32 %v272_v13, %v143_v17 }
  0xda   :  { %v148_v20 = vsel %vm147_vm3, %v272_v13, %v144_v19 }
  0xdb   :  { %v149_v21 = vmul.f32 %v148_v20, %v137_v18 }
  0xdd   :  { %v150_v22 = vmul.f32 %v149_v21, %v127_v53  ;;  %v155_v24 = vperm.slane %v149_v21, 0 }
  0xdf   :  { %v152_v23 = vrot.slane %v150_v22, 7  ;;  %v156_v26 = vmul.f32 %v155_v24, %v385_v40 }
  0xe1   :  { %v154_v25 = vsub.f32 %v137_v18, %v152_v23 }
  0xe3   :  { %v157_v27 = vperm.slane %v154_v25, 1 }
  0xe5   :  { %v158_v28 = vadd.f32 %v157_v27, %v156_v26 }
  0xe7   :  { %v259_v30 = vmul.f32 -1.442695, %v158_v28 }
  0xe9   :  { %273 = vpow2.f32 %v259_v30 }
  0xef   :  { %v274_v31 = vpop.eup %273 }
  0xf0   :  { %v162_v32 = vadd.f32 1.0, %v274_v31 }
  0xf2   :  { %275 = vrcp.f32 %v162_v32  ;;  %v174_v36 = vand.u32 2147483648, %v162_v32  ;;  %v172_v38 = vand.u32 2147483647, %v162_v32  ;;  %vm168_vm5 = vweird.f32 %v162_v32 }
  0xf4   :  { %v175_v40 = vor.u32 1.1754944e-38, %v174_v36  ;;  %vm173_vm7 = vcmp.eq.f32.partialorder %v172_v38, 8.507059e+37 }
  0xf8   :  { %v276_v33 = vpop.eup %275 }
  0xf9   :  { %v164_v34 = vmul.f32 %v276_v33, %v162_v32  ;;  %vm169_vm4 = vweird.f32 %v276_v33 }
  0xfa   :  { %vm170_vm6 = vmor %vm168_vm5, %vm169_vm4 }
  0xfb   :  { %v165_v35 = vsub.f32 1.0, %v164_v34 }
  0xfd   :  { %v166_v37 = vmul.f32 %v276_v33, %v165_v35 }
  0xff   :  { %v167_v39 = vadd.f32 %v276_v33, %v166_v37 }
 0x101   :  { %v171_v41 = vsel %vm170_vm6, %v276_v33, %v167_v39 }
 0x102   :  { %v176_v42 = vsel %vm173_vm7, %v175_v40, %v171_v41 }
 0x103   :  { %v178_v43 = vmul.f32 %v176_v42, %v158_v28 }
 0x105   :  { %215 = vmatmul.f32.vlgmr.msra.gmra.mxu2 %v178_v43 }
 0x188   :  { %v216_v45 = vpop.f32.mrf.mxu2 }
 0x189   :  { %v217_v46 = vadd.f32 %v268_v44, %v216_v45 }
 0x18b   :  { %v219_v47 = vmul.f32 0.5, %v217_v46 }
 0x18d   :  { %v220_v48 = vmul.f32 1.442695, %v219_v47 }
 0x18f   :  { %277 = vpow2.f32 %v220_v48 }
 0x195   :  { %v278_v50 = vpop.eup %277 }
 0x196   :  { %v227_v51 = vmul.f32 %v278_v50, %v225_v49 }
 0x198   :  { %229 = vrot.lane.b32.xlu0 %v227_v51, %s338_s16 }
 0x20a   :  { %v230_v52 = vpop.permute.xlu0 %229 }
 0x20b   :  { %v232_v53 = vadd.f32 %v230_v52, %v217_v46 }
 0x20d   :  { %279 = vtanh.f32 %v232_v53 }
 0x213   :  { %v280_v54 = vpop.eup %279 }
 0x214   :  { %235 = vrot.lane.b32.xlu1 %v280_v54, %s339_s17 }
 0x286   :  { %v236_v55 = vpop.permute.xlu1 %235 }
 0x287   :  { %v239_v56 = vsel %vm238_vm8, %v217_v46, %v236_v55 }
 0x288   :  { %241 = vst.msk [vmem:[#allocation5] sm:$0xff] %vm240_vm9, %v239_v56 }
 0x289   :  { %252 = dma.vmem_to_hbm [thread:$0]  %s248_s19, 128, %s250_s21, [#allocation4]  }
 0x28a   :  { %331 = dma.done.wait [#allocation4], 128  }
 0x28b   :  { %332 = vsyncadd [#allocation4], 4294967168 }
 0x28c   :  { %257 = vsyncpa [#allocation3], 1 }
 0x28d   :  { %258 = vsyncpa [#allocation4], 1 }

</bundles_post_ra>
